<compile_context>
chip_gen: v7x
topology: tpu7x:2x2x1
jax: 0.10.0
libtpu: 0.0.40
codegen_flags: <defaults>
</compile_context>

<pallas_src>
import jax
import jax.numpy as jnp
import numpy as np
from jax.experimental import pallas as pl
from jax.experimental.pallas import tpu as pltpu

# pruning_cfg.hard_concrete_endpoints
HC_LEFT = -0.1
HC_RIGHT = 1.1

_LANES = 128
_SUBLANES = 8
_VMEM_BUDGET_BYTES = 12 * 1024 * 1024   # fits v5e 16MiB scoped default; << v6e/v7x 32MiB
_MAX_TILE_N = 131072                    # v7x guidance cap


def _round_up(x, m):
    return ((x + m - 1) // m) * m


def _choose_tile_n(n, bsz_p):
    """Largest lane-dense tile whose double-buffered footprint fits the VMEM budget."""
    n128 = _round_up(n, _LANES)
    # double-buffered f32 bytes per lane column: 2 bufs x (unif in + mask out + 2 param rows)
    bytes_per_col = 2 * 4 * (2 * bsz_p + 2)
    tile = (_VMEM_BUDGET_BYTES // bytes_per_col) // _LANES * _LANES
    return max(_LANES, min(tile, _MAX_TILE_N, n128))


def _hard_concrete_from_unif(u, params_ref):
    """Shared elementwise math. u: (bsz_p, tile_n) f32 in [0, 1)."""
    alpha_scaled = params_ref[0:1, :]   # alpha / (relu(beta)+1e-3), broadcasts over bsz
    inv_denom = params_ref[1:2, :]      # 1 / (relu(beta)+1e-3)
    log_ratio = jnp.log(0.001 + u) - jnp.log(1.0 - u)          # 2 EUP ops
    pre = log_ratio * inv_denom + alpha_scaled                 # VPU
    concrete = 0.5 * jnp.tanh(0.5 * pre) + 0.5                 # sigmoid, 1 EUP op
    # Matches the torch source exactly: ((concrete + left) * (right - left)).clamp(0, 1)
    return jnp.clip((concrete + HC_LEFT) * (HC_RIGHT - HC_LEFT), 0.0, 1.0)


def _hard_concrete_kernel(unif_ref, params_ref, out_ref):
    out_ref[...] = _hard_concrete_from_unif(unif_ref[...], params_ref)


def _hard_concrete_rng_kernel(seed_ref, params_ref, out_ref):
    # seed lives in SMEM (scalar prefetch). Reseed per node-tile so every tile draws
    # an independent stream regardless of which TensorCore executes it.
    pltpu.prng_seed(seed_ref[0] + pl.program_id(0))
    bits = pltpu.bitcast(pltpu.prng_random_bits(out_ref.shape), jnp.int32)
    # 23 random mantissa bits -> uniform in [0, 1)
    u = (bits & jnp.int32(0x7FFFFF)).astype(jnp.float32) * jnp.float32(1.0 / 8388608.0)
    out_ref[...] = _hard_concrete_from_unif(u, params_ref)


def _pack_params(alpha, beta):
    """(2, n): row0 = alpha/(relu(beta)+1e-3), row1 = 1/(relu(beta)+1e-3). Exact f32."""
    inv_denom = 1.0 / (jnp.maximum(beta.astype(jnp.float32), 0.0) + 0.001)
    return jnp.stack([alpha.astype(jnp.float32) * inv_denom, inv_denom], axis=0)


def sample_prune_mask(unif, alpha, beta, *, tile_n=None):
    """Hard-concrete sampling. unif: (bsz, n); alpha/beta: (n,). Returns (bsz, n) f32."""
    bsz, n = unif.shape
    # Sublane guard: pad bsz to a multiple of 8 (one small copy) only if needed.
    bsz_p = _round_up(bsz, _SUBLANES) if bsz % _SUBLANES else bsz
    unif = unif.astype(jnp.float32)
    if bsz_p != bsz:
        unif = jnp.concatenate(
            [unif, jnp.full((bsz_p - bsz, n), 0.5, jnp.float32)], axis=0)

    params = _pack_params(alpha, beta)
    n128 = _round_up(n, _LANES)
    if tile_n is None:
        tile_n = _choose_tile_n(n, bsz_p)
    else:
        tile_n = max(_LANES, min(_round_up(tile_n, _LANES), n128))

    out = pl.pallas_call(
        _hard_concrete_kernel,
        out_shape=jax.ShapeDtypeStruct((bsz_p, n), jnp.float32),
        grid=(pl.cdiv(n, tile_n),),
        in_specs=[
            pl.BlockSpec((bsz_p, tile_n), lambda i: (0, i)),
            pl.BlockSpec((2, tile_n), lambda i: (0, i)),
        ],
        out_specs=pl.BlockSpec((bsz_p, tile_n), lambda i: (0, i)),
        compiler_params=pltpu.CompilerParams(
            dimension_semantics=("parallel",),   # independent node tiles (v7x megacore)
        ),
    )(unif, params)
    return out[:bsz] if bsz_p != bsz else out


def sample_prune_mask_rng(seed, alpha, beta, bsz, *, tile_n=None):
    """Same sampling, uniforms drawn in-kernel with the TPU hardware PRNG.

    Halves HBM input bytes for this memory-bound kernel (preferred on v5e/v6e in
    production).  Requires real TPU hardware (prng_seed has no interpret/CPU lowering)
    and is not bit-identical to torch.rand — therefore NOT exercised in __main__.
    """
    n = alpha.shape[0]
    bsz_p = _round_up(bsz, _SUBLANES) if bsz % _SUBLANES else bsz
    params = _pack_params(alpha, beta)
    n128 = _round_up(n, _LANES)
    if tile_n is None:
        tile_n = _choose_tile_n(n, bsz_p)
    else:
        tile_n = max(_LANES, min(_round_up(tile_n, _LANES), n128))
    seed_arr = jnp.asarray(seed, dtype=jnp.int32).reshape((1,))

    out = pl.pallas_call(
        _hard_concrete_rng_kernel,
        out_shape=jax.ShapeDtypeStruct((bsz_p, n), jnp.float32),
        grid_spec=pltpu.PrefetchScalarGridSpec(
            num_scalar_prefetch=1,
            grid=(pl.cdiv(n, tile_n),),
            in_specs=[pl.BlockSpec((2, tile_n), lambda i, seed_ref: (0, i))],
            out_specs=pl.BlockSpec((bsz_p, tile_n), lambda i, seed_ref: (0, i)),
        ),
        compiler_params=pltpu.CompilerParams(
            dimension_semantics=("parallel",),   # per-tile reseed -> order independent
        ),
    )(seed_arr, params)
    return out[:bsz] if bsz_p != bsz else out


def edge_mask_iterative_sampler_forward(attn_params, mlp_params, attn_unif, mlp_unif,
                                        *, tile_n=None):
    """EdgeMaskIterativeSampler.forward() for the current (component_type, cur_layer).

    attn_params: (n_heads, prev_nodes, 2)    sampling_params['attn-<type>'][cur_layer]
    mlp_params : (prev_nodes, 2)             sampling_params['mlp-<type>'][cur_layer]
    attn_unif  : (bsz, n_heads, prev_nodes)  uniform draws (torch.rand equivalent)
    mlp_unif   : (bsz, prev_nodes)

    Returns:
      sampling_params_cat: (n_heads*prev + prev, 2)  -- get_sampling_params() return
      attn_mask          : (bsz, n_heads, prev)      -- sampled_mask['attn-...'][cur_layer]
      mlp_mask           : (bsz, prev)               -- sampled_mask['mlp-...'][cur_layer]
    """
    bsz = mlp_unif.shape[0]
    nh, prev = attn_params.shape[0], attn_params.shape[1]
    n_attn = nh * prev

    # get_sampling_params(): cat(attn.flatten(0,-2), mlp.flatten(0,-2)) — tiny, exact.
    attn_flat = attn_params.reshape(n_attn, 2)
    mlp_flat = mlp_params.reshape(prev, 2)
    sampling_params_cat = jnp.concatenate([attn_flat, mlp_flat], axis=0)

    # Two direct kernel calls on the original arrays (reshapes are metadata-only):
    # no concat / pad / output slice of the (bsz, N) tensors.
    if n_attn > 0:   # mirrors `if prune_mask[...].nelement() > 0` in the torch source
        attn_mask = sample_prune_mask(
            attn_unif.reshape(bsz, n_attn), attn_flat[:, 0], attn_flat[:, 1],
            tile_n=tile_n).reshape(bsz, nh, prev)
    else:
        attn_mask = jnp.zeros((bsz, nh, prev), jnp.float32)

    mlp_mask = sample_prune_mask(mlp_unif, mlp_flat[:, 0], mlp_flat[:, 1], tile_n=tile_n)
    return sampling_params_cat, attn_mask, mlp_mask


def edge_mask_iterative_sampler_forward_rng(attn_params, mlp_params, bsz, seed):
    """Forward variant drawing uniforms in-kernel (real TPU hardware only)."""
    nh, prev = attn_params.shape[0], attn_params.shape[1]
    n_attn = nh * prev
    attn_flat = attn_params.reshape(n_attn, 2)
    mlp_flat = mlp_params.reshape(prev, 2)
    sampling_params_cat = jnp.concatenate([attn_flat, mlp_flat], axis=0)
    attn_mask = sample_prune_mask_rng(seed, attn_flat[:, 0], attn_flat[:, 1], bsz
                                      ).reshape(bsz, nh, prev)
    mlp_mask = sample_prune_mask_rng(seed + 1, mlp_flat[:, 0], mlp_flat[:, 1], bsz)
    return sampling_params_cat, attn_mask, mlp_mask


def _reference(unif, params):
    """Plain-JAX transcription of MaskSampler.sample_prune_mask (torch formula)."""
    alpha = params[..., 0]
    beta = params[..., 1]
    pre = (jnp.log(0.001 + unif) - jnp.log(1.0 - unif) + alpha) / (
        jnp.maximum(beta, 0.0) + 0.001)
    c = jax.nn.sigmoid(pre)
    return jnp.clip((c + HC_LEFT) * (HC_RIGHT - HC_LEFT), 0.0, 1.0)


if __name__ == "__main__":
    # Exact reciprocal + exact log now; only remaining diffs are ulp-level rounding
    # from the precomputed alpha/denom split and the tanh-form sigmoid.
    TOL = dict(rtol=0.0, atol=1e-4)
    fwd = jax.jit(edge_mask_iterative_sampler_forward, static_argnames=("tile_n",))

    key = jax.random.PRNGKey(0)
    k1, k2, k3, k4 = jax.random.split(key, 4)

    # pruning_cfg: n_samples=2, batch_size=4 -> bsz=8; n_heads=4, prev_nodes=16
    n_samples, batch_size = 2, 4
    bsz = n_samples * batch_size
    n_heads, prev_nodes = 4, 16

    attn_params = jax.random.normal(k1, (n_heads, prev_nodes, 2), dtype=jnp.float32)
    attn_params = attn_params.at[..., 1].set(2.0 / 3.0 + 0.1 * attn_params[..., 1])
    mlp_params = jax.random.normal(k2, (prev_nodes, 2), dtype=jnp.float32)
    mlp_params = mlp_params.at[..., 1].set(2.0 / 3.0 + 0.1 * mlp_params[..., 1])

    attn_unif = jax.random.uniform(k3, (bsz, n_heads, prev_nodes), dtype=jnp.float32)
    mlp_unif = jax.random.uniform(k4, (bsz, prev_nodes), dtype=jnp.float32)

    sp_cat, attn_mask, mlp_mask = fwd(attn_params, mlp_params, attn_unif, mlp_unif)
    jax.block_until_ready((sp_cat, attn_mask, mlp_mask))

    np.testing.assert_allclose(np.asarray(attn_mask),
                               np.asarray(_reference(attn_unif, attn_params)), **TOL)
    np.testing.assert_allclose(np.asarray(mlp_mask),
                               np.asarray(_reference(mlp_unif, mlp_params)), **TOL)
    assert sp_cat.shape == (n_heads * prev_nodes + prev_nodes, 2)
    np.testing.assert_allclose(
        np.asarray(sp_cat),
        np.concatenate([np.asarray(attn_params).reshape(-1, 2),
                        np.asarray(mlp_params).reshape(-1, 2)], axis=0))

    # Larger shapes: node count not a multiple of 128 (masked boundary lanes),
    # plus a forced small tile (multi-tile "parallel" grid with a partial last block).
    n_heads2, prev2 = 12, 769
    kk = jax.random.split(jax.random.PRNGKey(1), 4)
    ap2 = jax.random.normal(kk[0], (n_heads2, prev2, 2), dtype=jnp.float32)
    mp2 = jax.random.normal(kk[1], (prev2, 2), dtype=jnp.float32)
    au2 = jax.random.uniform(kk[2], (bsz, n_heads2, prev2), dtype=jnp.float32)
    mu2 = jax.random.uniform(kk[3], (bsz, prev2), dtype=jnp.float32)
    for tn in (None, 512):
        sp2, am2, mm2 = fwd(ap2, mp2, au2, mu2, tile_n=tn)
        jax.block_until_ready((sp2, am2, mm2))
        np.testing.assert_allclose(np.asarray(am2), np.asarray(_reference(au2, ap2)), **TOL)
        np.testing.assert_allclose(np.asarray(mm2), np.asarray(_reference(mu2, mp2)), **TOL)

    # bsz not a multiple of 8: exercises the sublane-padding guard.
    kk3 = jax.random.split(jax.random.PRNGKey(2), 2)
    bsz3 = 6
    au3 = jax.random.uniform(kk3[0], (bsz3, n_heads, prev_nodes), dtype=jnp.float32)
    mu3 = jax.random.uniform(kk3[1], (bsz3, prev_nodes), dtype=jnp.float32)
    sp3, am3, mm3 = fwd(attn_params, mlp_params, au3, mu3)
    jax.block_until_ready((sp3, am3, mm3))
    np.testing.assert_allclose(np.asarray(am3), np.asarray(_reference(au3, attn_params)), **TOL)
    np.testing.assert_allclose(np.asarray(mm3), np.asarray(_reference(mu3, mlp_params)), **TOL)

    # NOTE: sample_prune_mask_rng / edge_mask_iterative_sampler_forward_rng are the
    # production option on v5e/v6e (halves HBM traffic) but are not exercised here:
    # pltpu.prng_seed cannot be lowered in interpret/CPU mode and the draws are not
    # bit-identical to torch.rand.

    print("KERNEL_OK")
</pallas_src>

<mosaic_0001>
module attributes {stable_mosaic.version = 11 : i64} {
  func.func @_hard_concrete_kernel(%arg0: i32, %arg1: memref<8x128xf32, #tpu.memory_space<vmem>>, %arg2: memref<2x128xf32, #tpu.memory_space<vmem>>, %arg3: memref<8x128xf32, #tpu.memory_space<vmem>>) attributes {dimension_semantics = [#tpu.dimension_semantics<parallel>], iteration_bounds = array<i64: 1>, scalar_prefetch = 0 : i64, scratch_operands = 0 : i64, tpu.core_type = #tpu.core_type<tc>, window_params = [{transform_indices = @transform_0, window_bounds = array<i64: 8, 128>}, {transform_indices = @transform_1, window_bounds = array<i64: 2, 128>}, {transform_indices = @transform_2, window_bounds = array<i64: 8, 128>}]} {
    %c0 = arith.constant 0 : index
    %c0_0 = arith.constant 0 : index
    %0 = vector.load %arg1[%c0, %c0_0] : memref<8x128xf32, #tpu.memory_space<vmem>>, vector<8x128xf32>
    %c0_1 = arith.constant 0 : index
    %c0_2 = arith.constant 0 : index
    %1 = vector.load %arg2[%c0_1, %c0_2] : memref<2x128xf32, #tpu.memory_space<vmem>>, vector<1x128xf32>
    %c1 = arith.constant 1 : index
    %c0_3 = arith.constant 0 : index
    %2 = vector.load %arg2[%c1, %c0_3] : memref<2x128xf32, #tpu.memory_space<vmem>>, vector<1x128xf32>
    %cst = arith.constant 1.000000e-03 : f32
    %3 = vector.broadcast %cst : f32 to vector<8x128xf32>
    %4 = arith.addf %3, %0 : vector<8x128xf32>
    %5 = math.log %4 : vector<8x128xf32>
    %cst_4 = arith.constant 1.000000e+00 : f32
    %6 = vector.broadcast %cst_4 : f32 to vector<8x128xf32>
    %7 = arith.subf %6, %0 : vector<8x128xf32>
    %8 = math.log %7 : vector<8x128xf32>
    %9 = arith.subf %5, %8 : vector<8x128xf32>
    %10 = vector.broadcast %2 : vector<1x128xf32> to vector<8x128xf32>
    %11 = arith.mulf %9, %10 : vector<8x128xf32>
    %12 = vector.broadcast %1 : vector<1x128xf32> to vector<8x128xf32>
    %13 = arith.addf %11, %12 : vector<8x128xf32>
    %cst_5 = arith.constant 5.000000e-01 : f32
    %14 = vector.broadcast %cst_5 : f32 to vector<8x128xf32>
    %15 = arith.mulf %14, %13 : vector<8x128xf32>
    %16 = math.tanh %15 : vector<8x128xf32>
    %cst_6 = arith.constant 5.000000e-01 : f32
    %17 = vector.broadcast %cst_6 : f32 to vector<8x128xf32>
    %18 = arith.mulf %17, %16 : vector<8x128xf32>
    %cst_7 = arith.constant 5.000000e-01 : f32
    %19 = vector.broadcast %cst_7 : f32 to vector<8x128xf32>
    %20 = arith.addf %18, %19 : vector<8x128xf32>
    %cst_8 = arith.constant -1.000000e-01 : f32
    %21 = vector.broadcast %cst_8 : f32 to vector<8x128xf32>
    %22 = arith.addf %20, %21 : vector<8x128xf32>
    %cst_9 = arith.constant 1.200000e+00 : f32
    %23 = vector.broadcast %cst_9 : f32 to vector<8x128xf32>
    %24 = arith.mulf %22, %23 : vector<8x128xf32>
    %cst_10 = arith.constant 0.000000e+00 : f32
    %cst_11 = arith.constant 1.000000e+00 : f32
    %25 = vector.broadcast %cst_10 : f32 to vector<8x128xf32>
    %26 = arith.maximumf %25, %24 : vector<8x128xf32>
    %27 = vector.broadcast %cst_11 : f32 to vector<8x128xf32>
    %28 = arith.minimumf %27, %26 : vector<8x128xf32>
    %c0_12 = arith.constant 0 : index
    %c0_13 = arith.constant 0 : index
    %29 = vector.load %arg3[%c0_12, %c0_13] : memref<8x128xf32, #tpu.memory_space<vmem>>, vector<8x128xf32>
    tpu.vector_store %arg3[%c0_12, %c0_13], %28 {strides = array<i32>} : memref<8x128xf32, #tpu.memory_space<vmem>>, vector<8x128xf32>,
    return
  }
  func.func @transform_0(%arg0: i32) -> (i32, i32) {
    %c0_i32 = arith.constant 0 : i32
    %c0_i32_0 = arith.constant 0 : i32
    return %c0_i32, %arg0 : i32, i32
  }
  func.func @transform_1(%arg0: i32) -> (i32, i32) {
    %c0_i32 = arith.constant 0 : i32
    %c0_i32_0 = arith.constant 0 : i32
    return %c0_i32, %arg0 : i32, i32
  }
  func.func @transform_2(%arg0: i32) -> (i32, i32) {
    %c0_i32 = arith.constant 0 : i32
    %c0_i32_0 = arith.constant 0 : i32
    return %c0_i32, %arg0 : i32, i32
  }
}

module attributes {stable_mosaic.version = 11 : i64} {
  func.func @_hard_concrete_kernel(%arg0: i32, %arg1: memref<8x128xf32, #tpu.memory_space<vmem>>, %arg2: memref<2x128xf32, #tpu.memory_space<vmem>>, %arg3: memref<8x128xf32, #tpu.memory_space<vmem>>) attributes {dimension_semantics = [#tpu.dimension_semantics<parallel>], iteration_bounds = array<i64: 1>, scalar_prefetch = 0 : i64, scratch_operands = 0 : i64, tpu.core_type = #tpu.core_type<tc>, window_params = [{transform_indices = @transform_0, window_bounds = array<i64: 8, 128>}, {transform_indices = @transform_1, window_bounds = array<i64: 2, 128>}, {transform_indices = @transform_2, window_bounds = array<i64: 8, 128>}]} {
    %c0 = arith.constant 0 : index
    %c0_0 = arith.constant 0 : index
    %0 = vector.load %arg1[%c0, %c0_0] : memref<8x128xf32, #tpu.memory_space<vmem>>, vector<8x128xf32>
    %c0_1 = arith.constant 0 : index
    %c0_2 = arith.constant 0 : index
    %1 = vector.load %arg2[%c0_1, %c0_2] : memref<2x128xf32, #tpu.memory_space<vmem>>, vector<1x128xf32>
    %c1 = arith.constant 1 : index
    %c0_3 = arith.constant 0 : index
    %2 = vector.load %arg2[%c1, %c0_3] : memref<2x128xf32, #tpu.memory_space<vmem>>, vector<1x128xf32>
    %cst = arith.constant 1.000000e-03 : f32
    %3 = vector.broadcast %cst : f32 to vector<8x128xf32>
    %4 = arith.addf %3, %0 : vector<8x128xf32>
    %5 = math.log %4 : vector<8x128xf32>
    %cst_4 = arith.constant 1.000000e+00 : f32
    %6 = vector.broadcast %cst_4 : f32 to vector<8x128xf32>
    %7 = arith.subf %6, %0 : vector<8x128xf32>
    %8 = math.log %7 : vector<8x128xf32>
    %9 = arith.subf %5, %8 : vector<8x128xf32>
    %10 = vector.broadcast %2 : vector<1x128xf32> to vector<8x128xf32>
    %11 = arith.mulf %9, %10 : vector<8x128xf32>
    %12 = vector.broadcast %1 : vector<1x128xf32> to vector<8x128xf32>
    %13 = arith.addf %11, %12 : vector<8x128xf32>
    %cst_5 = arith.constant 5.000000e-01 : f32
    %14 = vector.broadcast %cst_5 : f32 to vector<8x128xf32>
    %15 = arith.mulf %14, %13 : vector<8x128xf32>
    %16 = math.tanh %15 : vector<8x128xf32>
    %cst_6 = arith.constant 5.000000e-01 : f32
    %17 = vector.broadcast %cst_6 : f32 to vector<8x128xf32>
    %18 = arith.mulf %17, %16 : vector<8x128xf32>
    %cst_7 = arith.constant 5.000000e-01 : f32
    %19 = vector.broadcast %cst_7 : f32 to vector<8x128xf32>
    %20 = arith.addf %18, %19 : vector<8x128xf32>
    %cst_8 = arith.constant -1.000000e-01 : f32
    %21 = vector.broadcast %cst_8 : f32 to vector<8x128xf32>
    %22 = arith.addf %20, %21 : vector<8x128xf32>
    %cst_9 = arith.constant 1.200000e+00 : f32
    %23 = vector.broadcast %cst_9 : f32 to vector<8x128xf32>
    %24 = arith.mulf %22, %23 : vector<8x128xf32>
    %cst_10 = arith.constant 0.000000e+00 : f32
    %cst_11 = arith.constant 1.000000e+00 : f32
    %25 = vector.broadcast %cst_10 : f32 to vector<8x128xf32>
    %26 = arith.maximumf %25, %24 : vector<8x128xf32>
    %27 = vector.broadcast %cst_11 : f32 to vector<8x128xf32>
    %28 = arith.minimumf %27, %26 : vector<8x128xf32>
    %c0_12 = arith.constant 0 : index
    %c0_13 = arith.constant 0 : index
    %29 = vector.load %arg3[%c0_12, %c0_13] : memref<8x128xf32, #tpu.memory_space<vmem>>, vector<8x128xf32>
    tpu.vector_store %arg3[%c0_12, %c0_13], %28 {strides = array<i32>} : memref<8x128xf32, #tpu.memory_space<vmem>>, vector<8x128xf32>,
    return
  }
  func.func @transform_0(%arg0: i32) -> (i32, i32) {
    %c0_i32 = arith.constant 0 : i32
    %c0_i32_0 = arith.constant 0 : i32
    return %c0_i32, %arg0 : i32, i32
  }
  func.func @transform_1(%arg0: i32) -> (i32, i32) {
    %c0_i32 = arith.constant 0 : i32
    %c0_i32_0 = arith.constant 0 : i32
    return %c0_i32, %arg0 : i32, i32
  }
  func.func @transform_2(%arg0: i32) -> (i32, i32) {
    %c0_i32 = arith.constant 0 : i32
    %c0_i32_0 = arith.constant 0 : i32
    return %c0_i32, %arg0 : i32, i32
  }
}

</mosaic_0001>

<bundles_post_ra>
// kernel: edge_mask_iterative_sampler_forward.3
= control target key start
LH: loop header
LB: loop body
LE: loop exit
PB: predicated region body
PF: predicated region fallthrough
CT: control target
= control target key end

     0   :  { %s125_s0 = inlined_call_operand.vmem [shape: f32[8,16], index: 0, kind: input, shape index: {}]   ;;  %s126_s1 = inlined_call_operand.vmem [shape: f32[2,16], index: 1, kind: input, shape index: {}]   ;;  %s127_s2 = inlined_call_operand.hbm [shape: f32[8,16], index: 2, kind: output, shape index: {}]  }
   0x1   :  { %v12_v0 = vld [vmem:[%s125_s0] sm:$0xff] }
   0x2   :  { %v15_v1 = vadd.f32 0.001, %v12_v0  ;;  %v18_v2 = vsub.f32 1.0, %v12_v0 }
   0x3   :  { %7 = vsyncpa [#allocation3], 0  ;;  %v55_v7 = vld [vmem:[%s126_s1 + $0x1] ss:$0 sm:$0xff]  ;;  %v56_v9 = vld [vmem:[%s126_s1] ss:$0 sm:$0xff] }
   0x4   :  { %58 = vlog2.f32 %v15_v1  ;;  %s88_s0 = smov [#allocation2]  }
   0x5   :  { %60 = vlog2.f32 %v18_v2  ;;  %s47_s15 = sshll.u32 %s88_s0, 4  ;;  %s48_s15 = int_to_ptr.vmem [resolvable:$true] %s47_s15 }
   0x6   :  { %s64_s16 = scalar_lea.vmem %s48_s15, 128  ;;  %p69_p1 = scmp.lt.s32.totalorder %s48_s15, %s48_s15 }
   0x7   :  { %p65_p0 = scmp.ne.s32.totalorder %s48_s15, %s64_s16  ;;  %p70_p2 = scmp.lt.s32.totalorder %s64_s16, %s64_s16 }
   0x9   :  { %p71_p3 = por %p70_p2, %p69_p1 }
   0xb   :  { %p72_p4 = pnand %p71_p3, %p65_p0 }
   0xe   :  { %v59_v3 = vpop.eup %58 }
   0xf   :  { %v61_v4 = vpop.eup %60  ;;  %v17_v5 = vmul.f32 0.6931472, %v59_v3 }
  0x10   :  { %v20_v6 = vmul.f32 0.6931472, %v61_v4 }
  0x12   :  { %v21_v8 = vsub.f32 %v17_v5, %v20_v6 }
  0x14   :  { %v26_v10 = vmul.f32 %v55_v7, %v21_v8 }
  0x16   :  { %v31_v11 = vadd.f32 %v56_v9, %v26_v10 }
  0x18   :  { %v32_v12 = vmul.f32 0.5, %v31_v11 }
  0x1a   :  { %62 = vtanh.f32 %v32_v12 }
  0x24   :  { %v63_v13 = vpop.eup %62 }
  0x25   :  { %v34_v14 = vmul.f32 0.5, %v63_v13 }
  0x27   :  { %v35_v15 = vadd.f32 0.5, %v34_v14 }
  0x29   :  { %v36_v16 = vadd.f32 -0.1, %v35_v15 }
  0x2b   :  { %v37_v17 = vmul.f32 1.2, %v36_v16 }
  0x2d   :  { %v38_v18 = vmax.f32 %v37_v17, 0.0 }
  0x2f   :  { %v39_v19 = vmin.f32 %v38_v18, 1.0 }
  0x31   :  { %40 = vst [vmem:[#allocation2] sm:$0xff] %v39_v19 }
  0x32   :  { %75 = shalt.err (!%p72_p4)
}
  0x33   :  { %s76_s18 = scalar_lea.hbm %s127_s2, 128 }
  0x34   :  { %p77_p5 = scmp.ne.s32.totalorder %s127_s2, %s76_s18  ;;  %p80_p6 = scmp.lt.u32.totalorder %s76_s18, %s127_s2 }
  0x36   :  { %p82_p7 = pnand %p80_p6, %p77_p5 }
  0x38   :  { %85 = shalt.err (!%p82_p7)
}
  0x39   :  { %50 = dma.vmem_to_hbm [thread:$0]  %s48_s15, 128, %s127_s2, [#allocation3]  }
  0x3a   :  { %86 = dma.done.wait [#allocation3], 128  }
  0x3b   :  { %87 = vsyncadd [#allocation3], 4294967168 }
  0x3c   :  { %54 = vsyncpa [#allocation3], 1 }

// kernel: edge_mask_iterative_sampler_forward.2
= control target key start
LH: loop header
LB: loop body
LE: loop exit
PB: predicated region body
PF: predicated region fallthrough
CT: control target
= control target key end

     0   :  { %s79_s0 = inlined_call_operand.vmem [shape: f32[8,64], index: 0, kind: input, shape index: {}]   ;;  %s80_s1 = inlined_call_operand.vmem [shape: f32[2,64], index: 1, kind: input, shape index: {}]   ;;  %s81_s2 = inlined_call_operand.vmem [shape: f32[8,64], index: 2, kind: output, shape index: {}]  }
   0x1   :  { %v11_v0 = vld [vmem:[%s79_s0] sm:$0xff] }
   0x2   :  { %v14_v1 = vadd.f32 0.001, %v11_v0  ;;  %v17_v2 = vsub.f32 1.0, %v11_v0  ;;  %v44_v7 = vld [vmem:[%s80_s1 + $0x1] ss:$0 sm:$0xff] }
   0x3   :  { %v45_v9 = vld [vmem:[%s80_s1] ss:$0 sm:$0xff] }
   0x4   :  { %46 = vlog2.f32 %v14_v1 }
   0x5   :  { %48 = vlog2.f32 %v17_v2 }
   0xe   :  { %v47_v3 = vpop.eup %46 }
   0xf   :  { %v49_v4 = vpop.eup %48  ;;  %v16_v5 = vmul.f32 0.6931472, %v47_v3 }
  0x10   :  { %v19_v6 = vmul.f32 0.6931472, %v49_v4 }
  0x12   :  { %v20_v8 = vsub.f32 %v16_v5, %v19_v6 }
  0x14   :  { %v25_v10 = vmul.f32 %v44_v7, %v20_v8 }
  0x16   :  { %v30_v11 = vadd.f32 %v45_v9, %v25_v10 }
  0x18   :  { %v31_v12 = vmul.f32 0.5, %v30_v11 }
  0x1a   :  { %50 = vtanh.f32 %v31_v12 }
  0x24   :  { %v51_v13 = vpop.eup %50 }
  0x25   :  { %v33_v14 = vmul.f32 0.5, %v51_v13 }
  0x27   :  { %v34_v15 = vadd.f32 0.5, %v33_v14 }
  0x29   :  { %v35_v16 = vadd.f32 -0.1, %v34_v15 }
  0x2b   :  { %v36_v17 = vmul.f32 1.2, %v35_v16 }
  0x2d   :  { %v37_v18 = vmax.f32 %v36_v17, 0.0 }
  0x2f   :  { %v38_v19 = vmin.f32 %v37_v18, 1.0 }
  0x31   :  { %39 = vst [vmem:[%s81_s2] sm:$0xff] %v38_v19 }

</bundles_post_ra>
